<compile_context>
chip_gen: v7x
topology: tpu7x:2x2x1
jax: 0.10.0
libtpu: 0.0.40
codegen_flags: <defaults>
</compile_context>

<pallas_src>
import jax
import jax.numpy as jnp
from jax.experimental import pallas as pl
from jax.experimental.pallas import tpu as pltpu

EPS = 1e-5            # BatchNorm3d default eps
F = 16                # self.num_features
PACK = 8              # voxels packed per lane-dense row
LANES = PACK * F      # 128 f32 lanes per packed row


def _bn_stats_kernel(conv_ref, sum_ref, sq_ref):
    """Accumulate per-column sum and sum-of-squares over all row tiles."""
    @pl.when(pl.program_id(0) == 0)
    def _():
        sum_ref[...] = jnp.zeros_like(sum_ref)
        sq_ref[...] = jnp.zeros_like(sq_ref)

    c = conv_ref[...]                                     # [TR, 128] f32 (packed)
    sum_ref[...] += jnp.sum(c, axis=0, keepdims=True)     # [1, 128]
    sq_ref[...] += jnp.sum(c * c, axis=0, keepdims=True)  # [1, 128]


def _bn_elu_kernel(conv_ref, xrep_ref, scale_ref, shift_ref, out_ref):
    """out = ELU(conv * scale + shift + x_repeat), all lane-dense [TR, 128]."""
    z = conv_ref[...] * scale_ref[...] + shift_ref[...] + xrep_ref[...]
    out_ref[...] = jnp.where(z > 0, z, jnp.exp(jnp.minimum(z, 0.0)) - 1.0)


def input_transition(x, w, b, gamma, beta, *, block_rows=2048):
    """VNet InputTransition forward.

    x: [N, C, D, H, W] f32; w: [16, C, 5, 5, 5] (OIDHW); b/gamma/beta: [16].
    block_rows: packed rows (8 voxels each) per grid step; default ~1 MiB tiles.
    """
    del b  # exact no-op: BatchNorm's batch-mean subtraction cancels the conv bias

    N, C, D, H, W = x.shape
    assert F % C == 0, "num_features must be a multiple of in_channels"
    rep = F // C
    M = N * D * H * W

    # ---- Conv3d (k=5, pad=2), channel-last, no bias, no HBM im2col. ----
    x_cl = jnp.transpose(x, (0, 2, 3, 4, 1))                  # [N, D, H, W, C]
    w_cl = jnp.transpose(w, (2, 3, 4, 1, 0))                  # [5,5,5,C,F] (DHWIO)
    conv = jax.lax.conv_general_dilated(
        x_cl, w_cl, window_strides=(1, 1, 1),
        padding=((2, 2), (2, 2), (2, 2)),
        dimension_numbers=("NDHWC", "DHWIO", "NDHWC"))        # [N, D, H, W, F]

    # ---- Lane-dense packing: 8 voxels * 16 channels = 128 lanes per row. ----
    total_rows = pl.cdiv(M, PACK)
    block_rows = ((block_rows + 7) // 8) * 8
    tr = min(block_rows, ((total_rows + 7) // 8) * 8)
    rows_pad = pl.cdiv(total_rows, tr) * tr
    m_pad = rows_pad * PACK
    grid = (rows_pad // tr,)

    conv_flat = conv.reshape(M, F)
    conv_pack = jnp.pad(conv_flat, ((0, m_pad - M), (0, 0))).reshape(rows_pad, LANES)

    # torch x.repeat(1, 16//C, 1, 1, 1) in the same packed layout (channel j -> j % C).
    xrep_flat = jnp.tile(x_cl.reshape(M, C), (1, rep))        # [M, 16]
    xrep_pack = jnp.pad(xrep_flat, ((0, m_pad - M), (0, 0))).reshape(rows_pad, LANES)

    tile_bytes = tr * LANES * 4
    vmem_bytes = min(8 * tile_bytes + (2 << 20), 100 * 1024 * 1024)

    # ---- Pass 1: per-channel batch statistics (reduction over the row grid). ----
    sum_pack, sq_pack = pl.pallas_call(
        _bn_stats_kernel,
        grid=grid,
        in_specs=[pl.BlockSpec((tr, LANES), lambda i: (i, 0))],
        out_specs=[pl.BlockSpec((1, LANES), lambda i: (0, 0)),
                   pl.BlockSpec((1, LANES), lambda i: (0, 0))],
        out_shape=[jax.ShapeDtypeStruct((1, LANES), jnp.float32),
                   jax.ShapeDtypeStruct((1, LANES), jnp.float32)],
        compiler_params=pltpu.CompilerParams(
            dimension_semantics=("arbitrary",),
            vmem_limit_bytes=vmem_bytes),
    )(conv_pack)

    # Fold mean/var/gamma/beta into a single per-channel scale/shift (tiny, in XLA).
    # Zero-padded rows contribute nothing to sum/sumsq; divide by the true M.
    ch_sum = jnp.sum(sum_pack.reshape(PACK, F), axis=0)       # [16]
    ch_sq = jnp.sum(sq_pack.reshape(PACK, F), axis=0)         # [16]
    mean = ch_sum / M
    var = jnp.maximum(ch_sq / M - mean * mean, 0.0)           # biased (training) variance
    scale = gamma * jax.lax.rsqrt(var + EPS)                  # [16]
    shift = beta - mean * scale                               # [16]
    scale_row = jnp.tile(scale, PACK).reshape(1, LANES)       # packed column order
    shift_row = jnp.tile(shift, PACK).reshape(1, LANES)

    # ---- Pass 2: normalize + residual + ELU (independent tiles -> 'parallel'). ----
    out_pack = pl.pallas_call(
        _bn_elu_kernel,
        grid=grid,
        in_specs=[pl.BlockSpec((tr, LANES), lambda i: (i, 0)),
                  pl.BlockSpec((tr, LANES), lambda i: (i, 0)),
                  pl.BlockSpec((1, LANES), lambda i: (0, 0)),
                  pl.BlockSpec((1, LANES), lambda i: (0, 0))],
        out_specs=pl.BlockSpec((tr, LANES), lambda i: (i, 0)),
        out_shape=jax.ShapeDtypeStruct((rows_pad, LANES), jnp.float32),
        compiler_params=pltpu.CompilerParams(
            dimension_semantics=("parallel",),
            vmem_limit_bytes=vmem_bytes),
    )(conv_pack, xrep_pack, scale_row, shift_row)

    out = out_pack.reshape(m_pad, F)[:M].reshape(N, D, H, W, F)
    return jnp.transpose(out, (0, 4, 1, 2, 3))                # back to NCDHW


def _reference(x, w, b, gamma, beta):
    """Pure-JAX reference of the PyTorch forward pass (bias included, NCDHW)."""
    conv = jax.lax.conv_general_dilated(
        x, w, window_strides=(1, 1, 1),
        padding=((2, 2), (2, 2), (2, 2)),
        dimension_numbers=("NCDHW", "OIDHW", "NCDHW"),
    ) + b.reshape(1, F, 1, 1, 1)
    mean = jnp.mean(conv, axis=(0, 2, 3, 4), keepdims=True)
    var = jnp.mean((conv - mean) ** 2, axis=(0, 2, 3, 4), keepdims=True)
    bn = (conv - mean) * jax.lax.rsqrt(var + EPS) \
        * gamma.reshape(1, F, 1, 1, 1) + beta.reshape(1, F, 1, 1, 1)
    x16 = jnp.tile(x, (1, F // x.shape[1], 1, 1, 1))
    z = bn + x16
    return jnp.where(z > 0, z, jnp.exp(jnp.minimum(z, 0.0)) - 1.0)


if __name__ == "__main__":
    # Small deterministic problem: N=2, C_in=4, D=H=W=16 (repeat_rate = 16/4 = 4).
    N, C, D, H, W = 2, 4, 16, 16, 16
    key = jax.random.PRNGKey(0)
    kx, kw, kb, kg, kbe = jax.random.split(key, 5)

    x = jax.random.normal(kx, (N, C, D, H, W), dtype=jnp.float32)
    w = 0.05 * jax.random.normal(kw, (F, C, 5, 5, 5), dtype=jnp.float32)
    b = 0.1 * jax.random.normal(kb, (F,), dtype=jnp.float32)
    gamma = 1.0 + 0.1 * jax.random.normal(kg, (F,), dtype=jnp.float32)
    beta = 0.1 * jax.random.normal(kbe, (F,), dtype=jnp.float32)

    # block_rows=256 so the demo exercises a multi-tile grid (4 steps); the
    # default (2048 packed rows ~ 1 MiB/stream tile) is the performance setting.
    out = input_transition(x, w, b, gamma, beta, block_rows=256)
    jax.block_until_ready(out)

    ref = _reference(x, w, b, gamma, beta)
    assert out.shape == (N, F, D, H, W)
    assert jnp.allclose(out, ref, atol=1e-2, rtol=1e-2)

    print("KERNEL_OK")
</pallas_src>

<mosaic_0001>
module attributes {stable_mosaic.version = 11 : i64} {
  func.func @_bn_stats_kernel(%arg0: i32, %arg1: memref<256x128xf32, #tpu.memory_space<vmem>>, %arg2: memref<1x128xf32, #tpu.memory_space<vmem>>, %arg3: memref<1x128xf32, #tpu.memory_space<vmem>>) attributes {dimension_semantics = [#tpu.dimension_semantics<arbitrary>], iteration_bounds = array<i64: 4>, scalar_prefetch = 0 : i64, scratch_operands = 0 : i64, tpu.core_type = #tpu.core_type<tc>, window_params = [{transform_indices = @transform_0, window_bounds = array<i64: 256, 128>}, {pipeline_mode = #tpu.pipeline_mode<synchronous>, transform_indices = @transform_1, window_bounds = array<i64: 1, 128>}, {pipeline_mode = #tpu.pipeline_mode<synchronous>, transform_indices = @transform_2, window_bounds = array<i64: 1, 128>}]} {
    %c0_i32 = arith.constant 0 : i32
    %0 = arith.cmpi eq, %arg0, %c0_i32 : i32
    %1 = arith.extui %0 : i1 to i32
    %c0_i32_0 = arith.constant 0 : i32
    %2 = arith.cmpi ne, %1, %c0_i32_0 : i32
    scf.if %2 {
      %cst_11 = arith.constant 0.000000e+00 : f32
      %15 = vector.broadcast %cst_11 : f32 to vector<1x128xf32>
      %c0_12 = arith.constant 0 : index
      %c0_13 = arith.constant 0 : index
      %16 = vector.load %arg2[%c0_12, %c0_13] : memref<1x128xf32, #tpu.memory_space<vmem>>, vector<1x128xf32>
      tpu.vector_store %arg2[%c0_12, %c0_13], %15 {strides = array<i32>} : memref<1x128xf32, #tpu.memory_space<vmem>>, vector<1x128xf32>,
      %cst_14 = arith.constant 0.000000e+00 : f32
      %17 = vector.broadcast %cst_14 : f32 to vector<1x128xf32>
      %c0_15 = arith.constant 0 : index
      %c0_16 = arith.constant 0 : index
      %18 = vector.load %arg3[%c0_15, %c0_16] : memref<1x128xf32, #tpu.memory_space<vmem>>, vector<1x128xf32>
      tpu.vector_store %arg3[%c0_15, %c0_16], %17 {strides = array<i32>} : memref<1x128xf32, #tpu.memory_space<vmem>>, vector<1x128xf32>,
    } else {
    }
    %c0 = arith.constant 0 : index
    %c0_1 = arith.constant 0 : index
    %3 = vector.load %arg1[%c0, %c0_1] : memref<256x128xf32, #tpu.memory_space<vmem>>, vector<256x128xf32>
    %c0_2 = arith.constant 0 : index
    %c0_3 = arith.constant 0 : index
    %4 = vector.load %arg2[%c0_2, %c0_3] : memref<1x128xf32, #tpu.memory_space<vmem>>, vector<1x128xf32>
    %cst = arith.constant dense<0.000000e+00> : vector<128xf32>
    %5 = vector.multi_reduction <add>, %3, %cst [0] : vector<256x128xf32> to vector<128xf32>
    %6 = vector.shape_cast %5 : vector<128xf32> to vector<1x128xf32>
    %7 = arith.addf %4, %6 : vector<1x128xf32>
    %c0_4 = arith.constant 0 : index
    %c0_5 = arith.constant 0 : index
    %8 = vector.load %arg2[%c0_4, %c0_5] : memref<1x128xf32, #tpu.memory_space<vmem>>, vector<1x128xf32>
    tpu.vector_store %arg2[%c0_4, %c0_5], %7 {strides = array<i32>} : memref<1x128xf32, #tpu.memory_space<vmem>>, vector<1x128xf32>,
    %c0_6 = arith.constant 0 : index
    %c0_7 = arith.constant 0 : index
    %9 = vector.load %arg3[%c0_6, %c0_7] : memref<1x128xf32, #tpu.memory_space<vmem>>, vector<1x128xf32>
    %10 = arith.mulf %3, %3 : vector<256x128xf32>
    %cst_8 = arith.constant dense<0.000000e+00> : vector<128xf32>
    %11 = vector.multi_reduction <add>, %10, %cst_8 [0] : vector<256x128xf32> to vector<128xf32>
    %12 = vector.shape_cast %11 : vector<128xf32> to vector<1x128xf32>
    %13 = arith.addf %9, %12 : vector<1x128xf32>
    %c0_9 = arith.constant 0 : index
    %c0_10 = arith.constant 0 : index
    %14 = vector.load %arg3[%c0_9, %c0_10] : memref<1x128xf32, #tpu.memory_space<vmem>>, vector<1x128xf32>
    tpu.vector_store %arg3[%c0_9, %c0_10], %13 {strides = array<i32>} : memref<1x128xf32, #tpu.memory_space<vmem>>, vector<1x128xf32>,
    return
  }
  func.func @transform_0(%arg0: i32) -> (i32, i32) {
    %c0_i32 = arith.constant 0 : i32
    %c0_i32_0 = arith.constant 0 : i32
    return %arg0, %c0_i32 : i32, i32
  }
  func.func @transform_1(%arg0: i32) -> (i32, i32) {
    %c0_i32 = arith.constant 0 : i32
    %c0_i32_0 = arith.constant 0 : i32
    %c0_i32_1 = arith.constant 0 : i32
    return %c0_i32, %c0_i32_0 : i32, i32
  }
  func.func @transform_2(%arg0: i32) -> (i32, i32) {
    %c0_i32 = arith.constant 0 : i32
    %c0_i32_0 = arith.constant 0 : i32
    %c0_i32_1 = arith.constant 0 : i32
    return %c0_i32, %c0_i32_0 : i32, i32
  }
}

</mosaic_0001>

<bundles_post_ra>
// kernel: tpu_custom_call.1
= control target key start
LH: loop header
LB: loop body
LE: loop exit
PB: predicated region body
PF: predicated region fallthrough
CT: control target
= control target key end

     0   :  { %8 = vsyncpa [#allocation3], 0  ;;  %s789_s0 = inlined_call_operand.hbm [shape: f32[1024,128], index: 0, kind: input, shape index: {}]   ;;  %s790_s1 = inlined_call_operand.hbm [shape: f32[1,128], index: 1, kind: output, shape index: {0}]   ;;  %s791_s2 = inlined_call_operand.hbm [shape: f32[1,128], index: 2, kind: output, shape index: {1}]  }
   0x1   :  { %10 = vsyncpa [#allocation3 + $0x1], 0 }
   0x2   :  { %11 = vsyncpa [#allocation4], 0 }
   0x3   :  { %12 = vsyncpa [#allocation7], 0  ;;  %s598_s9 = smov 0   ;;  %s600_s10 = smov 0  }
   0x4   :  { %s602_s11 = smov 0   ;;  %s604_s12 = smov 0  }
   0x5 LB: > { %s617_s13 = sadd.s32 4294967295, %s575_s12   ;;  %s620_s14 = sadd.s32 1, %s575_s12   ;;  %s575_s12 = sphi %s604_s12, %s798_s12   ;;  %s571_s11 = sphi %s602_s11, %s797_s11   ;;  %s567_s10 = sphi %s600_s10, %s796_s10   ;;  %s563_s9 = sphi %s598_s9, %s795_s9  }
   0x6   : > { %s22_s15 = ssub.s32 %s575_s12, %s620_s14  ;;  %s25_s16 = sadd.s32 1, %s571_s11 }
   0x7   : > { %p23_p0 = scmp.eq.s32.totalorder %s22_s15, 0  ;;  %p32_p1 = scmp.ne.s32.totalorder %s571_s11, %s567_s10 }
   0x8   : > { %p33_p2 = scmp.eq.s32.totalorder %s575_s12, 0  ;;  %p38_p3 = scmp.ne.s32.totalorder %s567_s10, %s563_s9 }
   0x9   : > { %s630_s17 = scalar_select %p23_p0, %s571_s11, %s25_s16  }
   0xa   : > { %p34_p4 = por %p33_p2, %p32_p1  ;;  %p39_p5 = scmp.eq.s32.totalorder %s617_s13, 0 }
   0xb   : > { %p409_p6 = scmp.lt.s32.totalorder %s575_s12, 4  ;;  %s104_s19 = sand.u32 1, %s571_s11  }
   0xc   : > { %p634_p7 = por %p39_p5, %p38_p3  ;;  %s382_s20 = sshll.u32 %s104_s19, 8 }
   0xd   : > { %s394_s21 = sshll.u32 %s575_s12, 12  ;;  %s108_s25 = scalar_lea.vmem [#allocation2], %s382_s20 }
   0xe   : > { %s643_s24 = scalar_lea.hbm %s789_s0, %s394_s21  ;;  %s115_s26 = sshll.u32 %s108_s25, 4  ;;  %s645_s26 = int_to_ptr.vmem [resolvable:$true] %s115_s26 }
   0xf   : > { %p647_p8 = pnand %p409_p6, %p34_p4  ;;  %s652_s28 = scalar_lea.sflag [#allocation3], %s104_s19 }
  0x10   : > { %s451_s29 = scalar_lea.hbm %s643_s24, 4096  ;;  %s456_s4 = scalar_lea.hbm %s789_s0, 16384 }
  0x11   : > { %p452_p10 = scmp.ne.s32.totalorder %s643_s24, %s451_s29  ;;  %p453_p11 = pneg %p647_p8 }
  0x12   : > { %p457_p0 = scmp.lt.u32.totalorder %s643_s24, %s789_s0  ;;  %p458_p1 = scmp.lt.u32.totalorder %s456_s4, %s451_s29 }
  0x13   : > { %p454_p12 = pnand %p453_p11, %p452_p10  ;;  %p460_p3 = scmp.lt.u32.totalorder %s451_s29, %s643_s24 }
  0x14   : > { %p459_p2 = por %p458_p1, %p457_p0 }
  0x15   : > { %p455_p13 = pneg %p454_p12 }
  0x16   : > { %p461_p4 = por %p460_p3, %p459_p2 }
  0x18   : > { %p462_p5 = pnand %p461_p4, %p455_p13 }
  0x1a   : > { %465 = shalt.err (!%p462_p5)
}
  0x1b   : > { %s466_s7 = scalar_lea.vmem %s645_s26, 4096  ;;  %s577_s8 = smov [#allocation2]  }
  0x1c   : > { %p467_p6 = scmp.ne.s32.totalorder %s645_s26, %s466_s7  ;;  %s471_s9 = sshll.u32 %s577_s8, 4  ;;  %s472_s9 = int_to_ptr.vmem [resolvable:$false] %s471_s9 }
  0x1d   : > { %s473_s15 = scalar_lea.vmem %s472_s9, 8192  ;;  %p474_p9 = scmp.lt.s32.totalorder %s645_s26, %s472_s9 }
  0x1e   : > { %p469_p10 = pnand %p467_p6, %p453_p11  ;;  %p475_p0 = scmp.lt.s32.totalorder %s473_s15, %s466_s7 }
  0x20   : > { %p470_p12 = pneg %p469_p10  ;;  %p476_p1 = por %p475_p0, %p474_p9 }
  0x22   : > { %p477_p2 = pnand %p476_p1, %p470_p12 }
  0x24   : > { %480 = shalt.err (!%p477_p2)
}
  0x25   : > { %s578_s16 = smov 128   ;;  %s579_s19 = smov 8  }
  0x26   : > { %408 = dma.hbm_to_vmem [thread:$0]  (!%p647_p8), %s643_s24, 4096, %s645_s26, %s652_s28, %s578_s16, %s578_s16, %s579_s19  }
  0x27   : > { %p123_p11 = scmp.lt.s32.totalorder %s575_s12, 5  ;;  %p794_p13 = scmp.ge.s32.totalorder %s575_s12, 1 }
  0x29   : > { %p124_p3 = pnand %p794_p13, %p123_p11 }
  0x2a   : > { %s129_s20 = sand.u32 (!%p124_p3), 1, %s567_s10  }
  0x2b   : > { %127 = sbr.rel (%p124_p3) target bundleno = 175 (0xaf), region = 24  ;;  %s386_s21 = sshll.u32 (!%p124_p3), %s129_s20, 8 }
  0x2c   : > { %s130_s22 = scalar_lea.sflag (!%p124_p3), [#allocation3], %s129_s20  ;;  %s684_s23 = scalar_lea.vmem (!%p124_p3), [#allocation2], %s386_s21 }
  0x32   : > { %550 = dma.done.wait (%p634_p7), %s130_s22, 4096  }
  0x33   : > { %552 = vsyncadd (%p634_p7), %s130_s22, 4294963200  ;;  %p387_p9 = scmp.ne.s32.totalorder %s617_s13, 0 }
  0x34   : > { %v580_v0 = vmov (!%p387_p9), 0.0  }
  0x35   : > { %153 = sbr.rel (%p387_p9) target bundleno = 60 (0x3c), region = 32  ;;  %154 = vst [vmem:[#allocation5] sm:$0x1] (!%p387_p9), %v580_v0  ;;  %155 = vst [vmem:[#allocation6] sm:$0x1] (!%p387_p9), %v580_v0 }
  0x3c PF: > { %v156_v1 = vld [vmem:[%s684_s23] sm:$0xff]  ;;  %v157_v2 = vld [vmem:[%s684_s23 + $0x8] sm:$0xff]  ;;  %v158_v3 = vld [vmem:[%s684_s23 + $0x10] sm:$0xff]  ;;  %s581_s12 = smov [#allocation5]   ;;  %p410_p7 = scmp.eq.s32.totalorder %s617_s13, 3 }
  0x3d   : > { %v159_v4 = vld [vmem:[%s684_s23 + $0x18] sm:$0xff]  ;;  %v189_v5 = vadd.f32 %v157_v2, %v156_v1  ;;  %v229_v6 = vmul.f32 %v156_v1, %v156_v1  ;;  %v230_v7 = vmul.f32 %v157_v2, %v157_v2  ;;  %v231_v8 = vmul.f32 %v158_v3, %v158_v3  ;;  %v160_v9 = vld [vmem:[%s684_s23 + $0x20] sm:$0xff]  ;;  %v161_v13 = vld [vmem:[%s684_s23 + $0x28] sm:$0xff]  ;;  %s307_s18 = sshll.u32 %s581_s12, 4  ;;  %s582_s24 = smov [#allocation6]   ;;  %s308_s18 = int_to_ptr.vmem [resolvable:$true] %s307_s18 }
  0x3e   : > { %v232_v11 = vmul.f32 %v159_v4, %v159_v4  ;;  %v233_v15 = vmul.f32 %v160_v9, %v160_v9  ;;  %v162_v17 = vld [vmem:[%s684_s23 + $0x30] sm:$0xff]  ;;  %v234_v19 = vmul.f32 %v161_v13, %v161_v13  ;;  %v163_v21 = vld [vmem:[%s684_s23 + $0x38] sm:$0xff]  ;;  %v164_v25 = vld [vmem:[%s684_s23 + $0x40] sm:$0xff]  ;;  %s318_s25 = sshll.u32 %s582_s24, 4  ;;  %s481_s26 = scalar_lea.vmem %s308_s18, 16  ;;  %s724_s25 = int_to_ptr.vmem [resolvable:$true] %s318_s25 }
  0x3f   : > { %v190_v10 = vadd.f32 %v189_v5, %v158_v3  ;;  %v261_v12 = vadd.f32 %v230_v7, %v229_v6  ;;  %v235_v23 = vmul.f32 %v162_v17, %v162_v17  ;;  %v236_v27 = vmul.f32 %v163_v21, %v163_v21  ;;  %v165_v29 = vld [vmem:[%s684_s23 + $0x48] sm:$0xff]  ;;  %v166_v33 = vld [vmem:[%s684_s23 + $0x50] sm:$0xff]  ;;  %v167_v37 = vld [vmem:[%s684_s23 + $0x58] sm:$0xff]  ;;  %p482_p8 = scmp.ne.s32.totalorder %s308_s18, %s481_s26  ;;  %s487_s27 = scalar_lea.vmem %s308_s18, 32 }
  0x40   : > { %v237_v31 = vmul.f32 %v164_v25, %v164_v25  ;;  %v238_v35 = vmul.f32 %v165_v29, %v165_v29  ;;  %v239_v39 = vmul.f32 %v166_v33, %v166_v33  ;;  %v168_v41 = vld [vmem:[%s684_s23 + $0x60] sm:$0xff]  ;;  %v240_v43 = vmul.f32 %v167_v37, %v167_v37  ;;  %v169_v45 = vld [vmem:[%s684_s23 + $0x68] sm:$0xff]  ;;  %v170_v49 = vld [vmem:[%s684_s23 + $0x70] sm:$0xff]  ;;  %p488_p6 = scmp.lt.s32.totalorder %s308_s18, %s308_s18  ;;  %p489_p10 = scmp.lt.s32.totalorder %s487_s27, %s481_s26 }
  0x41   : > { %v191_v14 = vadd.f32 %v190_v10, %v159_v4  ;;  %v262_v16 = vadd.f32 %v261_v12, %v231_v8  ;;  %v241_v47 = vmul.f32 %v168_v41, %v168_v41  ;;  %v242_v51 = vmul.f32 %v169_v45, %v169_v45  ;;  %v171_v53 = vld [vmem:[%s684_s23 + $0x78] sm:$0xff]  ;;  %v172_v57 = vld [vmem:[%s684_s23 + $0x80] sm:$0xff]  ;;  %v173_v61 = vld [vmem:[%s684_s23 + $0x88] sm:$0xff]  ;;  %p483_p4 = pnand %p482_p8, %p410_p7 }
  0x42   : > { %v243_v55 = vmul.f32 %v170_v49, %v170_v49  ;;  %v244_v59 = vmul.f32 %v171_v53, %v171_v53  ;;  %v245_v63 = vmul.f32 %v172_v57, %v172_v57  ;;  %v174_v1 = vld [vmem:[%s684_s23 + $0x90] sm:$0xff]  ;;  %v246_v3 = vmul.f32 %v173_v61, %v173_v61  ;;  %v175_v5 = vld [vmem:[%s684_s23 + $0x98] sm:$0xff]  ;;  %p490_p12 = por %p489_p10, %p488_p6 }
  0x43   : > { %v192_v18 = vadd.f32 %v191_v14, %v160_v9  ;;  %v263_v20 = vadd.f32 %v262_v16, %v232_v11  ;;  %v247_v7 = vmul.f32 %v174_v1, %v174_v1  ;;  %v176_v9 = vld [vmem:[%s684_s23 + $0xa0] sm:$0xff]  ;;  %v248_v11 = vmul.f32 %v175_v5, %v175_v5  ;;  %p484_p5 = pneg %p483_p4 }
  0x45   : > { %v193_v22 = vadd.f32 %v192_v18, %v161_v13  ;;  %v264_v24 = vadd.f32 %v263_v20, %v233_v15  ;;  %v177_v13 = vld [vmem:[%s684_s23 + $0xa8] sm:$0xff]  ;;  %v249_v15 = vmul.f32 %v176_v9, %v176_v9  ;;  %p491_p0 = pnand %p490_p12, %p484_p5 }
  0x47   : > { %v194_v26 = vadd.f32 %v193_v22, %v162_v17  ;;  %v265_v28 = vadd.f32 %v264_v24, %v234_v19  ;;  %v178_v17 = vld [vmem:[%s684_s23 + $0xb0] sm:$0xff]  ;;  %v250_v19 = vmul.f32 %v177_v13, %v177_v13 }
  0x49   : > { %v195_v30 = vadd.f32 %v194_v26, %v163_v21  ;;  %v266_v32 = vadd.f32 %v265_v28, %v235_v23  ;;  %v179_v21 = vld [vmem:[%s684_s23 + $0xb8] sm:$0xff]  ;;  %v251_v23 = vmul.f32 %v178_v17, %v178_v17 }
  0x4b   : > { %v196_v34 = vadd.f32 %v195_v30, %v164_v25  ;;  %v267_v36 = vadd.f32 %v266_v32, %v236_v27  ;;  %v180_v25 = vld [vmem:[%s684_s23 + $0xc0] sm:$0xff]  ;;  %v252_v27 = vmul.f32 %v179_v21, %v179_v21 }
  0x4d   : > { %v197_v38 = vadd.f32 %v196_v34, %v165_v29  ;;  %v268_v40 = vadd.f32 %v267_v36, %v237_v31  ;;  %v181_v29 = vld [vmem:[%s684_s23 + $0xc8] sm:$0xff]  ;;  %v253_v31 = vmul.f32 %v180_v25, %v180_v25 }
  0x4f   : > { %v198_v42 = vadd.f32 %v197_v38, %v166_v33  ;;  %v269_v44 = vadd.f32 %v268_v40, %v238_v35  ;;  %v182_v33 = vld [vmem:[%s684_s23 + $0xd0] sm:$0xff]  ;;  %v254_v35 = vmul.f32 %v181_v29, %v181_v29 }
  0x51   : > { %v199_v46 = vadd.f32 %v198_v42, %v167_v37  ;;  %v270_v48 = vadd.f32 %v269_v44, %v239_v39  ;;  %v183_v37 = vld [vmem:[%s684_s23 + $0xd8] sm:$0xff]  ;;  %v255_v39 = vmul.f32 %v182_v33, %v182_v33 }
  0x53   : > { %v200_v50 = vadd.f32 %v199_v46, %v168_v41  ;;  %v271_v52 = vadd.f32 %v270_v48, %v240_v43  ;;  %v184_v41 = vld [vmem:[%s684_s23 + $0xe0] sm:$0xff]  ;;  %v256_v43 = vmul.f32 %v183_v37, %v183_v37 }
  0x55   : > { %v201_v54 = vadd.f32 %v200_v50, %v169_v45  ;;  %v272_v56 = vadd.f32 %v271_v52, %v241_v47  ;;  %v185_v45 = vld [vmem:[%s684_s23 + $0xe8] sm:$0xff]  ;;  %v257_v47 = vmul.f32 %v184_v41, %v184_v41 }
  0x57   : > { %v202_v58 = vadd.f32 %v201_v54, %v170_v49  ;;  %v273_v60 = vadd.f32 %v272_v56, %v242_v51  ;;  %v186_v49 = vld [vmem:[%s684_s23 + $0xf0] sm:$0xff]  ;;  %v258_v51 = vmul.f32 %v185_v45, %v185_v45 }
  0x59   : > { %v203_v62 = vadd.f32 %v202_v58, %v171_v53  ;;  %v274_v0 = vadd.f32 %v273_v60, %v243_v55  ;;  %v187_v53 = vld [vmem:[%s684_s23 + $0xf8] sm:$0xff]  ;;  %v259_v55 = vmul.f32 %v186_v49, %v186_v49 }
  0x5a   : > { %v260_v58 = vmul.f32 %v187_v53, %v187_v53 }
  0x5b   : > { %v204_v2 = vadd.f32 %v203_v62, %v172_v57  ;;  %v275_v4 = vadd.f32 %v274_v0, %v244_v59 }
  0x5d   : > { %v205_v6 = vadd.f32 %v204_v2, %v173_v61  ;;  %v276_v8 = vadd.f32 %v275_v4, %v245_v63 }
  0x5f   : > { %v206_v10 = vadd.f32 %v205_v6, %v174_v1  ;;  %v277_v12 = vadd.f32 %v276_v8, %v246_v3 }
  0x61   : > { %v207_v14 = vadd.f32 %v206_v10, %v175_v5  ;;  %v278_v16 = vadd.f32 %v277_v12, %v247_v7  ;;  %v188_v7 = vld [vmem:[#allocation5] sm:$0x1]  ;;  %v228_v12 = vld [vmem:[#allocation6] sm:$0x1] }
  0x63   : > { %v208_v18 = vadd.f32 %v207_v14, %v176_v9  ;;  %v279_v20 = vadd.f32 %v278_v16, %v248_v11 }
  0x65   : > { %v209_v22 = vadd.f32 %v208_v18, %v177_v13  ;;  %v280_v24 = vadd.f32 %v279_v20, %v249_v15 }
  0x67   : > { %v210_v26 = vadd.f32 %v209_v22, %v178_v17  ;;  %v281_v28 = vadd.f32 %v280_v24, %v250_v19 }
  0x69   : > { %v211_v30 = vadd.f32 %v210_v26, %v179_v21  ;;  %v282_v32 = vadd.f32 %v281_v28, %v251_v23 }
  0x6b   : > { %v212_v34 = vadd.f32 %v211_v30, %v180_v25  ;;  %v283_v36 = vadd.f32 %v282_v32, %v252_v27 }
  0x6d   : > { %v213_v38 = vadd.f32 %v212_v34, %v181_v29  ;;  %v284_v40 = vadd.f32 %v283_v36, %v253_v31 }
  0x6f   : > { %v214_v42 = vadd.f32 %v213_v38, %v182_v33  ;;  %v285_v44 = vadd.f32 %v284_v40, %v254_v35 }
  0x71   : > { %v215_v46 = vadd.f32 %v214_v42, %v183_v37  ;;  %v286_v48 = vadd.f32 %v285_v44, %v255_v39 }
  0x73   : > { %v216_v50 = vadd.f32 %v215_v46, %v184_v41  ;;  %v287_v52 = vadd.f32 %v286_v48, %v256_v43 }
  0x75   : > { %v217_v54 = vadd.f32 %v216_v50, %v185_v45  ;;  %v288_v56 = vadd.f32 %v287_v52, %v257_v47 }
  0x77   : > { %v218_v57 = vadd.f32 %v217_v54, %v186_v49  ;;  %v289_v59 = vadd.f32 %v288_v56, %v258_v51 }
  0x79   : > { %v219_v60 = vadd.f32 %v218_v57, %v187_v53  ;;  %v290_v61 = vadd.f32 %v289_v59, %v259_v55 }
  0x7b   : > { %v220_v62 = vrot.slane %v219_v60, 4  ;;  %v291_v63 = vadd.f32 %v290_v61, %v260_v58 }
  0x7d   : > { %v221_v0 = vadd.f32 %v220_v62, %v219_v60  ;;  %v292_v1 = vrot.slane %v291_v63, 4 }
  0x7f   : > { %v222_v2 = vrot.slane %v221_v0, 2  ;;  %v293_v3 = vadd.f32 %v292_v1, %v291_v63 }
  0x81   : > { %v223_v4 = vadd.f32 %v222_v2, %v221_v0  ;;  %v294_v5 = vrot.slane %v293_v3, 2 }
  0x83   : > { %v224_v6 = vrot.slane %v223_v4, 1  ;;  %v295_v8 = vadd.f32 %v294_v5, %v293_v3 }
  0x85   : > { %v225_v9 = vadd.f32 %v224_v6, %v223_v4  ;;  %v296_v10 = vrot.slane %v295_v8, 1 }
  0x87   : > { %v226_v11 = vadd.f32 %v225_v9, %v188_v7  ;;  %v297_v13 = vadd.f32 %v296_v10, %v295_v8 }
  0x89   : > { %227 = vst [vmem:[#allocation5] sm:$0x1] %v226_v11  ;;  %v298_v14 = vadd.f32 %v297_v13, %v228_v12 }
  0x8a   : > { %494 = shalt.err (!%p491_p0)
}
  0x8b   : > { %s495_s30 = scalar_lea.hbm %s790_s1, 16 }
  0x8c   : > { %p496_p1 = scmp.ne.s32.totalorder %s790_s1, %s495_s30  ;;  %p501_p13 = scmp.lt.u32.totalorder %s495_s30, %s790_s1 }
  0x8e   : > { %p497_p2 = pnand %p496_p1, %p410_p7 }
  0x90   : > { %p498_p11 = pneg %p497_p2 }
  0x92   : > { %p503_p3 = pnand %p501_p13, %p498_p11 }
  0x94   : > { %506 = shalt.err (!%p503_p3)
}
  0x95   : > { %398 = dma.vmem_to_hbm [thread:$0]  (%p410_p7), %s308_s18, 16, %s790_s1, [#allocation4]   ;;  %299 = vst [vmem:[#allocation6] sm:$0x1] %v298_v14 }
  0x96   : > { %s507_s9 = scalar_lea.vmem %s724_s25, 16  ;;  %s513_s15 = scalar_lea.vmem %s724_s25, 32 }
  0x97   : > { %p508_p9 = scmp.ne.s32.totalorder %s724_s25, %s507_s9  ;;  %p514_p5 = scmp.lt.s32.totalorder %s724_s25, %s724_s25 }
  0x98   : > { %p515_p6 = scmp.lt.s32.totalorder %s513_s15, %s507_s9 }
  0x99   : > { %p509_p8 = pnand %p508_p9, %p410_p7 }
  0x9a   : > { %p516_p10 = por %p515_p6, %p514_p5 }
  0x9b   : > { %p510_p4 = pneg %p509_p8 }
  0x9d   : > { %p517_p12 = pnand %p516_p10, %p510_p4 }
  0x9f   : > { %520 = shalt.err (!%p517_p12)
}
  0xa0   : > { %s521_s20 = scalar_lea.hbm %s791_s2, 16 }
  0xa1   : > { %p522_p0 = scmp.ne.s32.totalorder %s791_s2, %s521_s20  ;;  %p527_p11 = scmp.lt.u32.totalorder %s521_s20, %s791_s2 }
  0xa3   : > { %p523_p1 = pnand %p522_p0, %p410_p7 }
  0xa5   : > { %p524_p2 = pneg %p523_p1 }
  0xa7   : > { %p529_p13 = pnand %p527_p11, %p524_p2 }
  0xa9   : > { %532 = shalt.err (!%p529_p13)
}
  0xaa   : > { %400 = dma.vmem_to_hbm [thread:$0]  (%p410_p7), %s724_s25, 16, %s791_s2, [#allocation7]  }
  0xab   : > { %554 = dma.done.wait (%p410_p7), [#allocation4], 16  }
  0xac   : > { %556 = vsyncadd (%p410_p7), [#allocation4], 4294967280 }
  0xad   : > { %558 = dma.done.wait (%p410_p7), [#allocation7], 16  }
  0xae   : > { %560 = vsyncadd (%p410_p7), [#allocation7], 4294967280 }
  0xaf PF: > { %p15_p3 = scmp.ge.s32.totalorder %s620_s14, 6   ;;  %s795_s9 = smov %s567_s10 }
  0xb0   : > { %s796_s10 = smov %s571_s11  ;;  %s797_s11 = smov %s630_s17 }
  0xb1   : > { %s798_s12 = smov %s620_s14  ;;  %17 = sbr.rel (!%p15_p3) target bundleno = 5 (0x5), region = 73 }
  0xb8   :  { %335 = vsyncpa [#allocation3], 1 }
  0xb9   :  { %337 = vsyncpa [#allocation3 + $0x1], 1 }
  0xba   :  { %338 = vsyncpa [#allocation4], 1 }
  0xbb   :  { %340 = vsyncpa [#allocation4 + $0x1], 1 }
  0xbc   :  { %341 = vsyncpa [#allocation7], 1 }

</bundles_post_ra>
